<compile_context>
chip_gen: v7x
topology: tpu7x:2x2x1
jax: 0.10.0
libtpu: 0.0.40
codegen_flags: <defaults>
</compile_context>

<pallas_src>
import math
from functools import partial

import jax
import jax.numpy as jnp
from jax.experimental import pallas as pl
from jax.experimental.pallas import tpu as pltpu

# ----------------------------- hyper-parameters -----------------------------
G = 4            # glimpse patch size g
K = 2            # number of patches per glimpse k
S_SCALE = 2      # scale factor s
IMG = (1, 16, 16)            # i = (C, H, W)
H_G = (32,)                  # h_g (array_like)
H_L = 16                     # h_l
HIDDEN = 32                  # hidden_size
LATENT = 8                   # latent_size
DEC = (32,)                  # dec_size (array_like)
NUM_CLASSES = 4              # num_classes
SAMPLES = 2                  # samples for forward predictions
B = 2                        # batch

C, H, W = IMG
OUT_SIZE = IMG[-1] ** 2                          # 256
D_PHI = K * G * G * C                            # 32
D1 = DEC[0]                                      # 32
PACK_USED = HIDDEN + NUM_CLASSES + 2 * LATENT    # 52

# ------------------- packed-slab row layout (w1: 224 x 128) -------------------
# Every block starts at a multiple of 8 sublanes so static slices never cross
# an (8,128) tile boundary.
R_WPHI = 0                              # (32, 32)  glimpse 'what'
R_WCORE = 32                            # (80, 32)  merged [i2h(what|where) ; h2h]
R_WLATH = 112                           # (32, 16)  latent, h_t part
R_WDC1 = 144                            # (32, 8)   decision fc1
R_WD1Z = 176                            # (8, 32)   decoder fc1, z part
R_WDC2 = 184                            # (8, 4)    decision fc2 (VPU FMAs)
R_WLOC = 192                            # (2, 16)   glimpse 'where' (VPU FMAs)
R_WLATO = 200                           # (4, 16)   latent, out_t part (VPU FMAs)
R_WD1O = 208                            # (4, 32)   decoder fc1, out_t part (VPU FMAs)
R_BIAS = 216                            # 7 bias rows (one per layer)
W1_ROWS = 224
W2_ROWS = 40                            # rows 0:32 = w_d2 (32,256), row 32 = b_d2

# --------------------- activation-slab column layout (B x 128) ----------------
C_PHI = 0                               # cols 0:32   phi
C_LOC = D_PHI                           # cols 32:34  l_t_prev
C_HPREV = D_PHI + 2                     # cols 34:66  h_prev
# rows batch : batch+S*B carry eps in cols 0:LATENT


# ------------------------------ Pallas kernel -------------------------------
def vpa_kernel(act_ref, w_ref, w2_ref, out_ref, *, batch, sb):
    f32 = jnp.float32
    dot = partial(jnp.dot, preferred_element_type=f32)
    relu = lambda v: jnp.maximum(v, 0.0)
    HG = H_G[0]

    def wblk(r0, rows, cols):
        return w_ref[r0:r0 + rows, 0:cols]

    def bias(i, cols):
        return w_ref[R_BIAS + i:R_BIAS + i + 1, 0:cols]

    act = act_ref[...]                                       # (8, 128) single load
    phi = act[0:batch, C_PHI:C_PHI + D_PHI]                  # (B, 32)
    lx = act[0:batch, C_LOC:C_LOC + 1]                       # (B, 1)
    ly = act[0:batch, C_LOC + 1:C_LOC + 2]                   # (B, 1)
    h_prev = act[0:batch, C_HPREV:C_HPREV + HIDDEN]          # (B, 32)
    eps = act[batch:batch + sb, 0:LATENT]                    # (S*B, 8)

    # ---- glimpse network: g_t = [relu(fc(phi)) , relu(fc(l))] ----
    what = relu(dot(phi, wblk(R_WPHI, D_PHI, HG)) + bias(0, HG))          # MXU #1
    w_loc = wblk(R_WLOC, 2, H_L)                                           # (2, 16)
    where = relu(lx * w_loc[0:1, :] + ly * w_loc[1:2, :] + bias(1, H_L))   # 2 VPU FMAs

    # ---- core network (merged i2h+h2h): h_t = relu([what|where|h_prev] @ W_core + b) ----
    h_in = jnp.concatenate([what, where, h_prev], axis=-1)                # (B, 80)
    h_t = relu(dot(h_in, wblk(R_WCORE, HG + H_L + HIDDEN, HIDDEN))        # MXU #2
               + bias(2, HIDDEN))

    # ---- latent, h part first (overlaps decision chain on the MXU) ----
    lat_h = dot(h_t, wblk(R_WLATH, HIDDEN, 2 * LATENT))                   # MXU #3

    # ---- decision network (classify=True) ----
    dh = relu(dot(h_t, wblk(R_WDC1, HIDDEN, LATENT)) + bias(3, LATENT))   # MXU #4
    w_dc2 = wblk(R_WDC2, LATENT, NUM_CLASSES)                             # (8, 4)
    out_t = bias(4, NUM_CLASSES) + dh[:, 0:1] * w_dc2[0:1, :]             # 8 VPU FMAs
    for j in range(1, LATENT):
        out_t = out_t + dh[:, j:j + 1] * w_dc2[j:j + 1, :]

    # ---- latent, out_t part as 4 VPU FMAs (no lane-concat) ----
    w_lat_o = wblk(R_WLATO, NUM_CLASSES, 2 * LATENT)                      # (4, 16)
    mu_lv = lat_h + bias(5, 2 * LATENT)
    for j in range(NUM_CLASSES):
        mu_lv = mu_lv + out_t[:, j:j + 1] * w_lat_o[j:j + 1, :]
    mu = mu_lv[:, :LATENT]
    std = jnp.exp(0.5 * mu_lv[:, LATENT:])

    # ---- decoder: all samples in one batched matmul pair ----
    rep = sb // batch                                                     # SAMPLES (static)
    mu_big = jnp.concatenate([mu] * rep, axis=0)                          # (S*B, 8) sample-major
    std_big = jnp.concatenate([std] * rep, axis=0)
    z_big = mu_big + std_big * eps                                        # reparametrize
    d1 = dot(z_big, wblk(R_WD1Z, LATENT, D1)) + bias(6, D1)               # MXU #5
    w_d1_o = wblk(R_WD1O, NUM_CLASSES, D1)                                # (4, 32)
    out_big = jnp.concatenate([out_t] * rep, axis=0)                      # (S*B, 4)
    for j in range(NUM_CLASSES):
        d1 = d1 + out_big[:, j:j + 1] * w_d1_o[j:j + 1, :]
    d1 = relu(d1)
    r = jax.nn.sigmoid(dot(d1, w2_ref[0:D1, :]) + w2_ref[D1:D1 + 1, :])   # MXU #6, (S*B, 256)

    # ---- single lane-dense, sublane-full (8,256) output slab, one unmasked store ----
    pack = jnp.concatenate(
        [h_t, out_t, mu_lv, jnp.zeros((batch, OUT_SIZE - PACK_USED), f32)], axis=-1)
    pieces = [r, pack]
    pad_rows = out_ref.shape[0] - sb - batch
    if pad_rows > 0:
        pieces.append(jnp.zeros((pad_rows, OUT_SIZE), f32))
    out_ref[...] = jnp.concatenate(pieces, axis=0)


# ------------------------------ JAX-side glue --------------------------------
def extract_glimpse(x, l, g, k, s):
    """Retina: extract k concentric patches (sizes g*s^j) centred at l in [-1,1],
    average-pool each to (g,g), concat along channel, flatten.
    TODO(synk): data-dependent gather + pooling kept in XLA glue (tiny,
    unaligned shapes); verify (row,col) vs (x,y) ordering against the original
    retina implementation."""
    b, c, h, w = x.shape
    max_size = g * (s ** (k - 1))
    pad = max_size
    xp = jnp.pad(x, ((0, 0), (0, 0), (pad, pad), (pad, pad)))
    centre = (0.5 * (l + 1.0) * jnp.array([h, w], dtype=x.dtype)).astype(jnp.int32) + pad
    patches = []
    for j in range(k):
        size = g * (s ** j)
        start = centre - size // 2  # (B, 2)

        def slice_one(img, st):
            return jax.lax.dynamic_slice(img, (0, st[0], st[1]), (c, size, size))

        patch = jax.vmap(slice_one)(xp, start)  # (B, C, size, size)
        if size > g:
            f = size // g
            patch = patch.reshape(b, c, g, f, g, f).mean(axis=(3, 5))
        patches.append(patch)
    phi = jnp.concatenate(patches, axis=1).reshape(b, -1)  # (B, k*C*g*g)
    return phi


def _linear_init(key, fan_in, fan_out):
    """PyTorch nn.Linear default init: U(-1/sqrt(fan_in), 1/sqrt(fan_in))."""
    kw, kb = jax.random.split(key)
    bound = 1.0 / math.sqrt(fan_in)
    w = jax.random.uniform(kw, (fan_in, fan_out), jnp.float32, -bound, bound)
    b = jax.random.uniform(kb, (1, fan_out), jnp.float32, -bound, bound)
    return w, b


def init_params(key):
    """Init every layer with PyTorch-style Linear init, then pack into two
    tile-aligned slabs (built once, host-side; numerically identical to the
    unpacked form — b_i2h + b_h2h fold is exact)."""
    keys = jax.random.split(key, 10)
    HG = H_G[0]
    w_phi, b_phi = _linear_init(keys[0], D_PHI, HG)
    w_loc, b_loc = _linear_init(keys[1], 2, H_L)
    w_i2h, b_i2h = _linear_init(keys[2], HG + H_L, HIDDEN)
    w_h2h, b_h2h = _linear_init(keys[3], HIDDEN, HIDDEN)
    w_core = jnp.concatenate([w_i2h, w_h2h], axis=0)          # (80, 32)
    b_core = b_i2h + b_h2h
    w_dc1, b_dc1 = _linear_init(keys[4], HIDDEN, LATENT)
    w_dc2, b_dc2 = _linear_init(keys[5], LATENT, NUM_CLASSES)
    w_mu, b_mu = _linear_init(keys[6], HIDDEN + NUM_CLASSES, LATENT)
    w_lv, b_lv = _linear_init(keys[7], HIDDEN + NUM_CLASSES, LATENT)
    w_lat = jnp.concatenate([w_mu, w_lv], axis=1)             # (36, 16)
    b_lat = jnp.concatenate([b_mu, b_lv], axis=1)             # (1, 16)
    w_d1, b_d1 = _linear_init(keys[8], LATENT + NUM_CLASSES, D1)
    w_d2, b_d2 = _linear_init(keys[9], D1, OUT_SIZE)

    w1 = jnp.zeros((W1_ROWS, 128), jnp.float32)
    w1 = w1.at[R_WPHI:R_WPHI + D_PHI, :HG].set(w_phi)
    w1 = w1.at[R_WCORE:R_WCORE + HG + H_L + HIDDEN, :HIDDEN].set(w_core)
    w1 = w1.at[R_WLATH:R_WLATH + HIDDEN, :2 * LATENT].set(w_lat[:HIDDEN])
    w1 = w1.at[R_WDC1:R_WDC1 + HIDDEN, :LATENT].set(w_dc1)
    w1 = w1.at[R_WD1Z:R_WD1Z + LATENT, :D1].set(w_d1[:LATENT])
    w1 = w1.at[R_WDC2:R_WDC2 + LATENT, :NUM_CLASSES].set(w_dc2)
    w1 = w1.at[R_WLOC:R_WLOC + 2, :H_L].set(w_loc)
    w1 = w1.at[R_WLATO:R_WLATO + NUM_CLASSES, :2 * LATENT].set(w_lat[HIDDEN:])
    w1 = w1.at[R_WD1O:R_WD1O + NUM_CLASSES, :D1].set(w_d1[LATENT:])
    w1 = w1.at[R_BIAS + 0, :HG].set(b_phi[0])
    w1 = w1.at[R_BIAS + 1, :H_L].set(b_loc[0])
    w1 = w1.at[R_BIAS + 2, :HIDDEN].set(b_core[0])
    w1 = w1.at[R_BIAS + 3, :LATENT].set(b_dc1[0])
    w1 = w1.at[R_BIAS + 4, :NUM_CLASSES].set(b_dc2[0])
    w1 = w1.at[R_BIAS + 5, :2 * LATENT].set(b_lat[0])
    w1 = w1.at[R_BIAS + 6, :D1].set(b_d1[0])

    w2 = jnp.zeros((W2_ROWS, OUT_SIZE), jnp.float32)
    w2 = w2.at[:D1, :].set(w_d2)
    w2 = w2.at[D1, :].set(b_d2[0])
    return {"w1": w1, "w2": w2}


@jax.jit
def vpa_forward(x, l_t_prev, h_prev, eps, params):
    """One timestep of VariationalPredictiveAttention (classify=True, samples fixed)."""
    batch = x.shape[0]
    sb = SAMPLES * batch

    phi = extract_glimpse(x, l_t_prev, G, K, S_SCALE)      # (B, D_PHI)
    eps2 = eps.reshape(-1, LATENT)                         # (S*B, LATENT), sample-major

    # Pack activations into one lane-dense slab: rows 0:B = [phi | l | h_prev],
    # rows B:B+S*B = eps; padded to 8 sublanes.
    act_rows = max(8, -(-(batch + sb) // 8) * 8)
    act = jnp.zeros((act_rows, 128), jnp.float32)
    act = act.at[:batch, C_PHI:C_PHI + D_PHI].set(phi)
    act = act.at[:batch, C_LOC:C_LOC + 2].set(l_t_prev)
    act = act.at[:batch, C_HPREV:C_HPREV + HIDDEN].set(h_prev)
    act = act.at[batch:batch + sb, :LATENT].set(eps2)

    out_rows = max(8, -(-(sb + batch) // 8) * 8)
    vmem = pl.BlockSpec(memory_space=pltpu.MemorySpace.VMEM)

    out = pl.pallas_call(
        partial(vpa_kernel, batch=batch, sb=sb),
        out_shape=jax.ShapeDtypeStruct((out_rows, OUT_SIZE), jnp.float32),
        in_specs=[vmem, vmem, vmem],
        out_specs=vmem,
        cost_estimate=pl.CostEstimate(
            flops=100_000, transcendentals=1_100, bytes_accessed=170_000),
    )(act, params["w1"], params["w2"])

    r_flat = out[:sb, :]                               # (S*B, 256)
    packed = out[sb:sb + batch, :]                     # (B, 256)
    h_t = packed[:, :HIDDEN]
    out_t = packed[:, HIDDEN:HIDDEN + NUM_CLASSES]
    mu = packed[:, HIDDEN + NUM_CLASSES:HIDDEN + NUM_CLASSES + LATENT]
    logvar = packed[:, HIDDEN + NUM_CLASSES + LATENT:PACK_USED]

    l_t = l_t_prev                                     # locator=False: l_t = l_t_prev.detach()
    # TODO(synk): reshape assumes C==1 (OUT_SIZE == H*W as in the reference decoder).
    r_t = r_flat.reshape(SAMPLES, batch, *IMG)         # (samples, B, C, H, W)
    return h_t, l_t, r_t, out_t, mu, logvar


# ----------------------------------- main ------------------------------------
if __name__ == "__main__":
    key = jax.random.PRNGKey(0)
    k_x, k_l, k_p, k_e = jax.random.split(key, 4)

    x = jax.random.normal(k_x, (B, *IMG), jnp.float32)              # NCHW
    l_t_prev = jax.random.uniform(k_l, (B, 2), jnp.float32, -1.0, 1.0)
    h_prev = jnp.zeros((B, HIDDEN), jnp.float32)                    # s_t_prev = zeros
    eps = jax.random.normal(k_e, (SAMPLES, B, LATENT), jnp.float32) # reparam noise
    params = init_params(k_p)

    outs = vpa_forward(x, l_t_prev, h_prev, eps, params)
    outs = jax.block_until_ready(outs)

    h_t, l_t, r_t, out_t, mu, logvar = outs
    assert h_t.shape == (B, HIDDEN)
    assert l_t.shape == (B, 2)
    assert r_t.shape == (SAMPLES, B, *IMG)
    assert out_t.shape == (B, NUM_CLASSES)
    assert mu.shape == (B, LATENT) and logvar.shape == (B, LATENT)
    assert bool(jnp.all(jnp.isfinite(r_t)))
    assert bool(jnp.all(jnp.isfinite(h_t)))
    print("KERNEL_OK")
</pallas_src>

<mosaic_0001>
module attributes {stable_mosaic.version = 11 : i64} {
  func.func @vpa_kernel(%arg0: memref<8x128xf32, #tpu.memory_space<vmem>>, %arg1: memref<224x128xf32, #tpu.memory_space<vmem>>, %arg2: memref<40x256xf32, #tpu.memory_space<vmem>>, %arg3: memref<8x256xf32, #tpu.memory_space<vmem>>) attributes {dimension_semantics = [], scalar_prefetch = 0 : i64, scratch_operands = 0 : i64, tpu.core_type = #tpu.core_type<tc>} {
    %c0 = arith.constant 0 : index
    %c0_0 = arith.constant 0 : index
    %0 = vector.load %arg0[%c0, %c0_0] : memref<8x128xf32, #tpu.memory_space<vmem>>, vector<8x128xf32>
    %1 = vector.extract_strided_slice %0 {offsets = [0, 0], sizes = [2, 32], strides = [1, 1]} : vector<8x128xf32> to vector<2x32xf32>
    %2 = vector.extract_strided_slice %0 {offsets = [0, 32], sizes = [2, 1], strides = [1, 1]} : vector<8x128xf32> to vector<2x1xf32>
    %3 = vector.extract_strided_slice %0 {offsets = [0, 33], sizes = [2, 1], strides = [1, 1]} : vector<8x128xf32> to vector<2x1xf32>
    %4 = vector.extract_strided_slice %0 {offsets = [0, 34], sizes = [2, 32], strides = [1, 1]} : vector<8x128xf32> to vector<2x32xf32>
    %5 = vector.extract_strided_slice %0 {offsets = [2, 0], sizes = [4, 8], strides = [1, 1]} : vector<8x128xf32> to vector<4x8xf32>
    %c0_1 = arith.constant 0 : index
    %c0_2 = arith.constant 0 : index
    %6 = vector.load %arg1[%c0_1, %c0_2] : memref<224x128xf32, #tpu.memory_space<vmem>>, vector<32x32xf32>
    %cst = arith.constant dense<0.000000e+00> : vector<2x32xf32>
    %7 = tpu.matmul %1, %6, %cst {dimension_numbers = #tpu.dot_dimension_numbers<[1], [0], [0], [1], [0, 0, 1, 1], [], []>} : vector<2x32xf32>, vector<32x32xf32>, vector<2x32xf32> -> vector<2x32xf32>
    %c216 = arith.constant 216 : index
    %c0_3 = arith.constant 0 : index
    %8 = vector.load %arg1[%c216, %c0_3] : memref<224x128xf32, #tpu.memory_space<vmem>>, vector<1x32xf32>
    %9 = vector.broadcast %8 : vector<1x32xf32> to vector<2x32xf32>
    %10 = arith.addf %7, %9 : vector<2x32xf32>
    %cst_4 = arith.constant 0.000000e+00 : f32
    %11 = vector.broadcast %cst_4 : f32 to vector<2x32xf32>
    %12 = arith.maximumf %10, %11 : vector<2x32xf32>
    %c192 = arith.constant 192 : index
    %c0_5 = arith.constant 0 : index
    %13 = vector.load %arg1[%c192, %c0_5] : memref<224x128xf32, #tpu.memory_space<vmem>>, vector<2x16xf32>
    %14 = vector.extract_strided_slice %13 {offsets = [0, 0], sizes = [1, 16], strides = [1, 1]} : vector<2x16xf32> to vector<1x16xf32>
    %15 = vector.broadcast %2 : vector<2x1xf32> to vector<2x16xf32>
    %16 = vector.broadcast %14 : vector<1x16xf32> to vector<2x16xf32>
    %17 = arith.mulf %15, %16 : vector<2x16xf32>
    %18 = vector.extract_strided_slice %13 {offsets = [1, 0], sizes = [1, 16], strides = [1, 1]} : vector<2x16xf32> to vector<1x16xf32>
    %19 = vector.broadcast %3 : vector<2x1xf32> to vector<2x16xf32>
    %20 = vector.broadcast %18 : vector<1x16xf32> to vector<2x16xf32>
    %21 = arith.mulf %19, %20 : vector<2x16xf32>
    %22 = arith.addf %17, %21 : vector<2x16xf32>
    %c217 = arith.constant 217 : index
    %c0_6 = arith.constant 0 : index
    %23 = vector.load %arg1[%c217, %c0_6] : memref<224x128xf32, #tpu.memory_space<vmem>>, vector<1x16xf32>
    %24 = vector.broadcast %23 : vector<1x16xf32> to vector<2x16xf32>
    %25 = arith.addf %22, %24 : vector<2x16xf32>
    %cst_7 = arith.constant 0.000000e+00 : f32
    %26 = vector.broadcast %cst_7 : f32 to vector<2x16xf32>
    %27 = arith.maximumf %25, %26 : vector<2x16xf32>
    %28 = tpu.concatenate %12, %27, %4 in 1 : vector<2x32xf32>, vector<2x16xf32>, vector<2x32xf32> -> vector<2x80xf32>
    %c32 = arith.constant 32 : index
    %c0_8 = arith.constant 0 : index
    %29 = vector.load %arg1[%c32, %c0_8] : memref<224x128xf32, #tpu.memory_space<vmem>>, vector<80x32xf32>
    %cst_9 = arith.constant dense<0.000000e+00> : vector<2x32xf32>
    %30 = tpu.matmul %28, %29, %cst_9 {dimension_numbers = #tpu.dot_dimension_numbers<[1], [0], [0], [1], [0, 0, 1, 1], [], []>} : vector<2x80xf32>, vector<80x32xf32>, vector<2x32xf32> -> vector<2x32xf32>
    %c218 = arith.constant 218 : index
    %c0_10 = arith.constant 0 : index
    %31 = vector.load %arg1[%c218, %c0_10] : memref<224x128xf32, #tpu.memory_space<vmem>>, vector<1x32xf32>
    %32 = vector.broadcast %31 : vector<1x32xf32> to vector<2x32xf32>
    %33 = arith.addf %30, %32 : vector<2x32xf32>
    %cst_11 = arith.constant 0.000000e+00 : f32
    %34 = vector.broadcast %cst_11 : f32 to vector<2x32xf32>
    %35 = arith.maximumf %33, %34 : vector<2x32xf32>
    %c112 = arith.constant 112 : index
    %c0_12 = arith.constant 0 : index
    %36 = vector.load %arg1[%c112, %c0_12] : memref<224x128xf32, #tpu.memory_space<vmem>>, vector<32x16xf32>
    %cst_13 = arith.constant dense<0.000000e+00> : vector<2x16xf32>
    %37 = tpu.matmul %35, %36, %cst_13 {dimension_numbers = #tpu.dot_dimension_numbers<[1], [0], [0], [1], [0, 0, 1, 1], [], []>} : vector<2x32xf32>, vector<32x16xf32>, vector<2x16xf32> -> vector<2x16xf32>
    %c144 = arith.constant 144 : index
    %c0_14 = arith.constant 0 : index
    %38 = vector.load %arg1[%c144, %c0_14] : memref<224x128xf32, #tpu.memory_space<vmem>>, vector<32x8xf32>
    %cst_15 = arith.constant dense<0.000000e+00> : vector<2x8xf32>
    %39 = tpu.matmul %35, %38, %cst_15 {dimension_numbers = #tpu.dot_dimension_numbers<[1], [0], [0], [1], [0, 0, 1, 1], [], []>} : vector<2x32xf32>, vector<32x8xf32>, vector<2x8xf32> -> vector<2x8xf32>
    %c219 = arith.constant 219 : index
    %c0_16 = arith.constant 0 : index
    %40 = vector.load %arg1[%c219, %c0_16] : memref<224x128xf32, #tpu.memory_space<vmem>>, vector<1x8xf32>
    %41 = vector.broadcast %40 : vector<1x8xf32> to vector<2x8xf32>
    %42 = arith.addf %39, %41 : vector<2x8xf32>
    %cst_17 = arith.constant 0.000000e+00 : f32
    %43 = vector.broadcast %cst_17 : f32 to vector<2x8xf32>
    %44 = arith.maximumf %42, %43 : vector<2x8xf32>
    %c184 = arith.constant 184 : index
    %c0_18 = arith.constant 0 : index
    %45 = vector.load %arg1[%c184, %c0_18] : memref<224x128xf32, #tpu.memory_space<vmem>>, vector<8x4xf32>
    %c220 = arith.constant 220 : index
    %c0_19 = arith.constant 0 : index
    %46 = vector.load %arg1[%c220, %c0_19] : memref<224x128xf32, #tpu.memory_space<vmem>>, vector<1x4xf32>
    %47 = vector.extract_strided_slice %44 {offsets = [0, 0], sizes = [2, 1], strides = [1, 1]} : vector<2x8xf32> to vector<2x1xf32>
    %48 = vector.extract_strided_slice %45 {offsets = [0, 0], sizes = [1, 4], strides = [1, 1]} : vector<8x4xf32> to vector<1x4xf32>
    %49 = vector.broadcast %47 : vector<2x1xf32> to vector<2x4xf32>
    %50 = vector.broadcast %48 : vector<1x4xf32> to vector<2x4xf32>
    %51 = arith.mulf %49, %50 : vector<2x4xf32>
    %52 = vector.broadcast %46 : vector<1x4xf32> to vector<2x4xf32>
    %53 = arith.addf %52, %51 : vector<2x4xf32>
    %54 = vector.extract_strided_slice %44 {offsets = [0, 1], sizes = [2, 1], strides = [1, 1]} : vector<2x8xf32> to vector<2x1xf32>
    %55 = vector.extract_strided_slice %45 {offsets = [1, 0], sizes = [1, 4], strides = [1, 1]} : vector<8x4xf32> to vector<1x4xf32>
    %56 = vector.broadcast %54 : vector<2x1xf32> to vector<2x4xf32>
    %57 = vector.broadcast %55 : vector<1x4xf32> to vector<2x4xf32>
    %58 = arith.mulf %56, %57 : vector<2x4xf32>
    %59 = arith.addf %53, %58 : vector<2x4xf32>
    %60 = vector.extract_strided_slice %44 {offsets = [0, 2], sizes = [2, 1], strides = [1, 1]} : vector<2x8xf32> to vector<2x1xf32>
    %61 = vector.extract_strided_slice %45 {offsets = [2, 0], sizes = [1, 4], strides = [1, 1]} : vector<8x4xf32> to vector<1x4xf32>
    %62 = vector.broadcast %60 : vector<2x1xf32> to vector<2x4xf32>
    %63 = vector.broadcast %61 : vector<1x4xf32> to vector<2x4xf32>
    %64 = arith.mulf %62, %63 : vector<2x4xf32>
    %65 = arith.addf %59, %64 : vector<2x4xf32>
    %66 = vector.extract_strided_slice %44 {offsets = [0, 3], sizes = [2, 1], strides = [1, 1]} : vector<2x8xf32> to vector<2x1xf32>
    %67 = vector.extract_strided_slice %45 {offsets = [3, 0], sizes = [1, 4], strides = [1, 1]} : vector<8x4xf32> to vector<1x4xf32>
    %68 = vector.broadcast %66 : vector<2x1xf32> to vector<2x4xf32>
    %69 = vector.broadcast %67 : vector<1x4xf32> to vector<2x4xf32>
    %70 = arith.mulf %68, %69 : vector<2x4xf32>
    %71 = arith.addf %65, %70 : vector<2x4xf32>
    %72 = vector.extract_strided_slice %44 {offsets = [0, 4], sizes = [2, 1], strides = [1, 1]} : vector<2x8xf32> to vector<2x1xf32>
    %73 = vector.extract_strided_slice %45 {offsets = [4, 0], sizes = [1, 4], strides = [1, 1]} : vector<8x4xf32> to vector<1x4xf32>
    %74 = vector.broadcast %72 : vector<2x1xf32> to vector<2x4xf32>
    %75 = vector.broadcast %73 : vector<1x4xf32> to vector<2x4xf32>
    %76 = arith.mulf %74, %75 : vector<2x4xf32>
    %77 = arith.addf %71, %76 : vector<2x4xf32>
    %78 = vector.extract_strided_slice %44 {offsets = [0, 5], sizes = [2, 1], strides = [1, 1]} : vector<2x8xf32> to vector<2x1xf32>
    %79 = vector.extract_strided_slice %45 {offsets = [5, 0], sizes = [1, 4], strides = [1, 1]} : vector<8x4xf32> to vector<1x4xf32>
    %80 = vector.broadcast %78 : vector<2x1xf32> to vector<2x4xf32>
    %81 = vector.broadcast %79 : vector<1x4xf32> to vector<2x4xf32>
    %82 = arith.mulf %80, %81 : vector<2x4xf32>
    %83 = arith.addf %77, %82 : vector<2x4xf32>
    %84 = vector.extract_strided_slice %44 {offsets = [0, 6], sizes = [2, 1], strides = [1, 1]} : vector<2x8xf32> to vector<2x1xf32>
    %85 = vector.extract_strided_slice %45 {offsets = [6, 0], sizes = [1, 4], strides = [1, 1]} : vector<8x4xf32> to vector<1x4xf32>
    %86 = vector.broadcast %84 : vector<2x1xf32> to vector<2x4xf32>
    %87 = vector.broadcast %85 : vector<1x4xf32> to vector<2x4xf32>
    %88 = arith.mulf %86, %87 : vector<2x4xf32>
    %89 = arith.addf %83, %88 : vector<2x4xf32>
    %90 = vector.extract_strided_slice %44 {offsets = [0, 7], sizes = [2, 1], strides = [1, 1]} : vector<2x8xf32> to vector<2x1xf32>
    %91 = vector.extract_strided_slice %45 {offsets = [7, 0], sizes = [1, 4], strides = [1, 1]} : vector<8x4xf32> to vector<1x4xf32>
    %92 = vector.broadcast %90 : vector<2x1xf32> to vector<2x4xf32>
    %93 = vector.broadcast %91 : vector<1x4xf32> to vector<2x4xf32>
    %94 = arith.mulf %92, %93 : vector<2x4xf32>
    %95 = arith.addf %89, %94 : vector<2x4xf32>
    %c200 = arith.constant 200 : index
    %c0_20 = arith.constant 0 : index
    %96 = vector.load %arg1[%c200, %c0_20] : memref<224x128xf32, #tpu.memory_space<vmem>>, vector<4x16xf32>
    %c221 = arith.constant 221 : index
    %c0_21 = arith.constant 0 : index
    %97 = vector.load %arg1[%c221, %c0_21] : memref<224x128xf32, #tpu.memory_space<vmem>>, vector<1x16xf32>
    %98 = vector.broadcast %97 : vector<1x16xf32> to vector<2x16xf32>
    %99 = arith.addf %37, %98 : vector<2x16xf32>
    %100 = vector.extract_strided_slice %95 {offsets = [0, 0], sizes = [2, 1], strides = [1, 1]} : vector<2x4xf32> to vector<2x1xf32>
    %101 = vector.extract_strided_slice %96 {offsets = [0, 0], sizes = [1, 16], strides = [1, 1]} : vector<4x16xf32> to vector<1x16xf32>
    %102 = vector.broadcast %100 : vector<2x1xf32> to vector<2x16xf32>
    %103 = vector.broadcast %101 : vector<1x16xf32> to vector<2x16xf32>
    %104 = arith.mulf %102, %103 : vector<2x16xf32>
    %105 = arith.addf %99, %104 : vector<2x16xf32>
    %106 = vector.extract_strided_slice %95 {offsets = [0, 1], sizes = [2, 1], strides = [1, 1]} : vector<2x4xf32> to vector<2x1xf32>
    %107 = vector.extract_strided_slice %96 {offsets = [1, 0], sizes = [1, 16], strides = [1, 1]} : vector<4x16xf32> to vector<1x16xf32>
    %108 = vector.broadcast %106 : vector<2x1xf32> to vector<2x16xf32>
    %109 = vector.broadcast %107 : vector<1x16xf32> to vector<2x16xf32>
    %110 = arith.mulf %108, %109 : vector<2x16xf32>
    %111 = arith.addf %105, %110 : vector<2x16xf32>
    %112 = vector.extract_strided_slice %95 {offsets = [0, 2], sizes = [2, 1], strides = [1, 1]} : vector<2x4xf32> to vector<2x1xf32>
    %113 = vector.extract_strided_slice %96 {offsets = [2, 0], sizes = [1, 16], strides = [1, 1]} : vector<4x16xf32> to vector<1x16xf32>
    %114 = vector.broadcast %112 : vector<2x1xf32> to vector<2x16xf32>
    %115 = vector.broadcast %113 : vector<1x16xf32> to vector<2x16xf32>
    %116 = arith.mulf %114, %115 : vector<2x16xf32>
    %117 = arith.addf %111, %116 : vector<2x16xf32>
    %118 = vector.extract_strided_slice %95 {offsets = [0, 3], sizes = [2, 1], strides = [1, 1]} : vector<2x4xf32> to vector<2x1xf32>
    %119 = vector.extract_strided_slice %96 {offsets = [3, 0], sizes = [1, 16], strides = [1, 1]} : vector<4x16xf32> to vector<1x16xf32>
    %120 = vector.broadcast %118 : vector<2x1xf32> to vector<2x16xf32>
    %121 = vector.broadcast %119 : vector<1x16xf32> to vector<2x16xf32>
    %122 = arith.mulf %120, %121 : vector<2x16xf32>
    %123 = arith.addf %117, %122 : vector<2x16xf32>
    %124 = vector.extract_strided_slice %123 {offsets = [0, 0], sizes = [2, 8], strides = [1, 1]} : vector<2x16xf32> to vector<2x8xf32>
    %125 = vector.extract_strided_slice %123 {offsets = [0, 8], sizes = [2, 8], strides = [1, 1]} : vector<2x16xf32> to vector<2x8xf32>
    %cst_22 = arith.constant 5.000000e-01 : f32
    %126 = vector.broadcast %cst_22 : f32 to vector<2x8xf32>
    %127 = arith.mulf %126, %125 : vector<2x8xf32>
    %128 = math.exp %127 : vector<2x8xf32>
    %129 = tpu.concatenate %124, %124 in 0 : vector<2x8xf32>, vector<2x8xf32> -> vector<4x8xf32>
    %130 = tpu.concatenate %128, %128 in 0 : vector<2x8xf32>, vector<2x8xf32> -> vector<4x8xf32>
    %131 = arith.mulf %130, %5 : vector<4x8xf32>
    %132 = arith.addf %129, %131 : vector<4x8xf32>
    %c176 = arith.constant 176 : index
    %c0_23 = arith.constant 0 : index
    %133 = vector.load %arg1[%c176, %c0_23] : memref<224x128xf32, #tpu.memory_space<vmem>>, vector<8x32xf32>
    %cst_24 = arith.constant dense<0.000000e+00> : vector<4x32xf32>
    %134 = tpu.matmul %132, %133, %cst_24 {dimension_numbers = #tpu.dot_dimension_numbers<[1], [0], [0], [1], [0, 0, 1, 1], [], []>} : vector<4x8xf32>, vector<8x32xf32>, vector<4x32xf32> -> vector<4x32xf32>
    %c222 = arith.constant 222 : index
    %c0_25 = arith.constant 0 : index
    %135 = vector.load %arg1[%c222, %c0_25] : memref<224x128xf32, #tpu.memory_space<vmem>>, vector<1x32xf32>
    %136 = vector.broadcast %135 : vector<1x32xf32> to vector<4x32xf32>
    %137 = arith.addf %134, %136 : vector<4x32xf32>
    %c208 = arith.constant 208 : index
    %c0_26 = arith.constant 0 : index
    %138 = vector.load %arg1[%c208, %c0_26] : memref<224x128xf32, #tpu.memory_space<vmem>>, vector<4x32xf32>
    %139 = tpu.concatenate %95, %95 in 0 : vector<2x4xf32>, vector<2x4xf32> -> vector<4x4xf32>
    %140 = vector.extract_strided_slice %139 {offsets = [0, 0], sizes = [4, 1], strides = [1, 1]} : vector<4x4xf32> to vector<4x1xf32>
    %141 = vector.extract_strided_slice %138 {offsets = [0, 0], sizes = [1, 32], strides = [1, 1]} : vector<4x32xf32> to vector<1x32xf32>
    %142 = vector.broadcast %140 : vector<4x1xf32> to vector<4x32xf32>
    %143 = vector.broadcast %141 : vector<1x32xf32> to vector<4x32xf32>
    %144 = arith.mulf %142, %143 : vector<4x32xf32>
    %145 = arith.addf %137, %144 : vector<4x32xf32>
    %146 = vector.extract_strided_slice %139 {offsets = [0, 1], sizes = [4, 1], strides = [1, 1]} : vector<4x4xf32> to vector<4x1xf32>
    %147 = vector.extract_strided_slice %138 {offsets = [1, 0], sizes = [1, 32], strides = [1, 1]} : vector<4x32xf32> to vector<1x32xf32>
    %148 = vector.broadcast %146 : vector<4x1xf32> to vector<4x32xf32>
    %149 = vector.broadcast %147 : vector<1x32xf32> to vector<4x32xf32>
    %150 = arith.mulf %148, %149 : vector<4x32xf32>
    %151 = arith.addf %145, %150 : vector<4x32xf32>
    %152 = vector.extract_strided_slice %139 {offsets = [0, 2], sizes = [4, 1], strides = [1, 1]} : vector<4x4xf32> to vector<4x1xf32>
    %153 = vector.extract_strided_slice %138 {offsets = [2, 0], sizes = [1, 32], strides = [1, 1]} : vector<4x32xf32> to vector<1x32xf32>
    %154 = vector.broadcast %152 : vector<4x1xf32> to vector<4x32xf32>
    %155 = vector.broadcast %153 : vector<1x32xf32> to vector<4x32xf32>
    %156 = arith.mulf %154, %155 : vector<4x32xf32>
    %157 = arith.addf %151, %156 : vector<4x32xf32>
    %158 = vector.extract_strided_slice %139 {offsets = [0, 3], sizes = [4, 1], strides = [1, 1]} : vector<4x4xf32> to vector<4x1xf32>
    %159 = vector.extract_strided_slice %138 {offsets = [3, 0], sizes = [1, 32], strides = [1, 1]} : vector<4x32xf32> to vector<1x32xf32>
    %160 = vector.broadcast %158 : vector<4x1xf32> to vector<4x32xf32>
    %161 = vector.broadcast %159 : vector<1x32xf32> to vector<4x32xf32>
    %162 = arith.mulf %160, %161 : vector<4x32xf32>
    %163 = arith.addf %157, %162 : vector<4x32xf32>
    %cst_27 = arith.constant 0.000000e+00 : f32
    %164 = vector.broadcast %cst_27 : f32 to vector<4x32xf32>
    %165 = arith.maximumf %163, %164 : vector<4x32xf32>
    %c0_28 = arith.constant 0 : index
    %c0_29 = arith.constant 0 : index
    %166 = vector.load %arg2[%c0_28, %c0_29] : memref<40x256xf32, #tpu.memory_space<vmem>>, vector<32x256xf32>
    %cst_30 = arith.constant dense<0.000000e+00> : vector<4x256xf32>
    %167 = tpu.matmul %165, %166, %cst_30 {dimension_numbers = #tpu.dot_dimension_numbers<[1], [0], [0], [1], [0, 0, 1, 1], [], []>} : vector<4x32xf32>, vector<32x256xf32>, vector<4x256xf32> -> vector<4x256xf32>
    %c32_31 = arith.constant 32 : index
    %c0_32 = arith.constant 0 : index
    %168 = vector.load %arg2[%c32_31, %c0_32] : memref<40x256xf32, #tpu.memory_space<vmem>>, vector<1x256xf32>
    %169 = vector.broadcast %168 : vector<1x256xf32> to vector<4x256xf32>
    %170 = arith.addf %167, %169 : vector<4x256xf32>
    %171 = arith.negf %170 : vector<4x256xf32>
    %172 = math.exp %171 : vector<4x256xf32>
    %cst_33 = arith.constant 1.000000e+00 : f32
    %173 = vector.broadcast %cst_33 : f32 to vector<4x256xf32>
    %174 = arith.addf %173, %172 : vector<4x256xf32>
    %175 = arith.divf %173, %174 : vector<4x256xf32>
    %cst_34 = arith.constant 0.000000e+00 : f32
    %176 = vector.broadcast %cst_34 : f32 to vector<2x204xf32>
    %177 = tpu.concatenate %35, %95, %123, %176 in 1 : vector<2x32xf32>, vector<2x4xf32>, vector<2x16xf32>, vector<2x204xf32> -> vector<2x256xf32>
    %cst_35 = arith.constant 0.000000e+00 : f32
    %178 = vector.broadcast %cst_35 : f32 to vector<2x256xf32>
    %179 = tpu.concatenate %175, %177, %178 in 0 : vector<4x256xf32>, vector<2x256xf32>, vector<2x256xf32> -> vector<8x256xf32>
    %c0_36 = arith.constant 0 : index
    %c0_37 = arith.constant 0 : index
    %180 = vector.load %arg3[%c0_36, %c0_37] : memref<8x256xf32, #tpu.memory_space<vmem>>, vector<8x256xf32>
    tpu.vector_store %arg3[%c0_36, %c0_37], %179 {strides = array<i32>} : memref<8x256xf32, #tpu.memory_space<vmem>>, vector<8x256xf32>,
    return
  }
}

</mosaic_0001>

<bundles_post_ra>
// kernel: custom-call
= control target key start
LH: loop header
LB: loop body
LE: loop exit
PB: predicated region body
PF: predicated region fallthrough
CT: control target
= control target key end

     0   :  { %s6_s0 = inlined_call_operand.vmem [shape: f32[2,1,4,4], index: 0, kind: output, shape index: {}]  }

// kernel: custom-call.1
= control target key start
LH: loop header
LB: loop body
LE: loop exit
PB: predicated region body
PF: predicated region fallthrough
CT: control target
= control target key end

     0   :  { %s6_s0 = inlined_call_operand.vmem [shape: f32[2,1,8,8], index: 0, kind: output, shape index: {}]  }

// kernel: vpa_forward.1
= control target key start
LH: loop header
LB: loop body
LE: loop exit
PB: predicated region body
PF: predicated region fallthrough
CT: control target
= control target key end

     0   :  { %v994_v0 = vmov 32   ;;  %v995_v2 = vmov 0.0|0.0   ;;  %vm996_vm0 = vmmov 0   ;;  %v997_v8 = vmov 0.0   ;;  %s999_s21 = smov 32   ;;  %s1000_s22 = smov 14   ;;  %s1267_s0 = inlined_call_operand.vmem [shape: f32[8,128], index: 0, kind: input, shape index: {}]   ;;  %s1268_s1 = inlined_call_operand.vmem [shape: f32[224,128], index: 1, kind: input, shape index: {}]   ;;  %s1269_s2 = inlined_call_operand.vmem [shape: f32[40,256], index: 2, kind: input, shape index: {}]   ;;  %s1270_s3 = inlined_call_operand.vmem [shape: f32[8,256], index: 3, kind: output, shape index: {}]  }
   0x1   :  { %965 = vset.pattern.permute.xlu0 %v994_v0  ;;  %v1035_v1 = vld [vmem:[%s1267_s0] sm:$0xff]  ;;  %906 = vmatprep.subr.bf16.mxu0 %v995_v2  ;;  %v16_v4 = vld [vmem:[%s1268_s1 + $0x8] sm:$0xff]  ;;  %v17_v6 = vld [vmem:[%s1268_s1 + $0x10] sm:$0xff]  ;;  %v998_v10 = vmov 33   ;;  %vm24_vm1 = vcmask 261120   ;;  %v104_v23 = vlaneseq  ;;  %vm134_vm2 = vcmask 392192  }
   0x2   :  { %v15_v3 = vld [vmem:[%s1268_s1] sm:$0xff]  ;;  %101 = vperm.xlu0 %965, %v1035_v1   ;;  %v18_v7 = vld [vmem:[%s1268_s1 + $0x18] sm:$0xff]  ;;  %853 = vmatprep.mubr.msk.f32.mxu0 %vm996_vm0, %v997_v8  ;;  %v137_v12 = vld [vmem:[%s1268_s1 + $0x28] sm:$0xff]  ;;  %vm151_vm3 = vcmask 654336   ;;  %s1009_s18 = smov 8   ;;  %vm523_vm4 = vcmask 1041408  }
   0x3   :  { %v907_v5 = vpack.c.bf16 %v16_v4, %v15_v3  ;;  %912 = vmatprep.subr.bf16.mxu1 %v995_v2  ;;  %876 = vmatprep.mubr.msk.f32.mxu1 %vm996_vm0, %v997_v8  ;;  %v910_v9 = vpack.c.bf16 %v18_v7, %v17_v6  ;;  %v136_v11 = vld [vmem:[%s1268_s1 + $0x20] sm:$0xff]  ;;  %v138_v13 = vld [vmem:[%s1268_s1 + $0x30] sm:$0xff]  ;;  %v139_v15 = vld [vmem:[%s1268_s1 + $0x38] sm:$0xff]  ;;  %v1091_v24 = vshrl.u32 %v104_v23, 7  ;;  %v1002_v6 = vmov 1   ;;  %s1010_s25 = smov 36  }
   0x4   :  { %v913_v14 = vpack.c.bf16 %v137_v12, %v136_v11  ;;  %v916_v16 = vpack.c.bf16 %v139_v15, %v138_v13  ;;  %v140_v17 = vld [vmem:[%s1268_s1 + $0x40] sm:$0xff]  ;;  %v141_v18 = vld [vmem:[%s1268_s1 + $0x48] sm:$0xff]  ;;  %v142_v20 = vld [vmem:[%s1268_s1 + $0x50] sm:$0xff]  ;;  %v1004_v15 = vmov 2   ;;  %s1011_s26 = smov 120   ;;  %vm545_vm5 = vcmask 64512  }
   0x5   :  { %908 = vmatpush3.bf16.msra.mxu0 %v907_v5  ;;  %v919_v19 = vpack.c.bf16 %v141_v18, %v140_v17  ;;  %v143_v21 = vld [vmem:[%s1268_s1 + $0x58] sm:$0xff]  ;;  %v1094_v25 = vsub.s32 0, %v1091_v24  ;;  %v1097_v26 = vsub.s32 1, %v1091_v24  ;;  %v99_v27 = vld [vmem:[%s1268_s1 + $0xc0] sm:$0x3]  ;;  %v145_v30 = vld [vmem:[%s1268_s1 + $0x68] sm:$0xff] }
   0x6   :  { %909 = vmatprep.subr.bf16.mxu0 %v995_v2  ;;  %966 = vset.pattern.permute.xlu0 %v998_v10  ;;  %v922_v22 = vpack.c.bf16 %v143_v21, %v142_v20  ;;  %v144_v29 = vld [vmem:[%s1268_s1 + $0x60] sm:$0xff]  ;;  %v230_v37 = vld [vmem:[%s1268_s1 + $0x90] sm:$0xff]  ;;  %v231_v38 = vld [vmem:[%s1268_s1 + $0x98] sm:$0xff]  ;;  %v1001_v5 = vmov 0   ;;  %v1006_v17 = vmov 3   ;;  %v1007_v18 = vmov 5  }
   0x7   :  { %110 = vperm.xlu0 %966, %v1035_v1   ;;  %914 = vmatpush3.bf16.msra.mxu1 %v913_v14  ;;  %v925_v31 = vpack.c.bf16 %v145_v30, %v144_v29  ;;  %v107_v32 = vrot.slane %v99_v27, %v1094_v25  ;;  %v116_v33 = vrot.slane %v99_v27, %v1097_v26  ;;  %v803_v39 = vld [vmem:[%s1268_s1 + $0xd9] ss:$0 sm:$0xff]  ;;  %v801_v46 = vld [vmem:[%s1268_s1 + $0xd8] ss:$0 sm:$0xff]  ;;  %v232_v53 = vld [vmem:[%s1268_s1 + $0xa0] sm:$0xff]  ;;  %v1003_v14 = vmov 4  }
   0x8   :  { %915 = vmatprep.subr.bf16.mxu1 %v995_v2  ;;  %v928_v40 = vpack.c.bf16 %v231_v38, %v230_v37  ;;  %v233_v54 = vld [vmem:[%s1268_s1 + $0xa8] sm:$0xff]  ;;  %v804_v56 = vld [vmem:[%s1268_s1 + $0xda] ss:$0 sm:$0xff]  ;;  %v226_v57 = vld [vmem:[%s1268_s1 + $0x70] sm:$0xff]  ;;  %967 = vset.pattern.permute.xlu1 %v1001_v5  ;;  %vm779_vm6 = vcmask 293888   ;;  %vm781_vm7 = vcmask 424960  }
   0x9   :  { %911 = vmatpush3.bf16.msra.mxu0 %v910_v9  ;;  %v931_v55 = vpack.c.bf16 %v233_v54, %v232_v53  ;;  %v227_v58 = vld [vmem:[%s1268_s1 + $0x78] sm:$0xff]  ;;  %v228_v0 = vld [vmem:[%s1268_s1 + $0x80] sm:$0xff]  ;;  %v229_v3 = vld [vmem:[%s1268_s1 + $0x88] sm:$0xff]  ;;  %vm789_vm8 = vcmask 1043456   ;;  %vm792_vm9 = vcmask 1045504  }
   0xa   :  { %927 = vmatprep.subr.bf16.mxu0 %v995_v2  ;;  %v934_v62 = vpack.c.bf16 %v227_v58, %v226_v57  ;;  %v937_v4 = vpack.c.bf16 %v229_v3, %v228_v0  ;;  %v806_v7 = vld [vmem:[%s1268_s1 + $0xdb] ss:$0 sm:$0xff]  ;;  %v808_v23 = vld [vmem:[%s1268_s1 + $0xdc] ss:$0 sm:$0xff] }
   0xb   :  { %917 = vmatpush3.bf16.msra.mxu1 %v916_v16  ;;  %968 = vset.pattern.permute.xlu0 %v1002_v6  ;;  %v1005_v16 = vmov 7   ;;  %v313_v20 = vld [vmem:[%s1268_s1 + $0xb8] sm:$0xff] }
   0xc   :  { %854 = vmatmul.mubr.msk.f32.vlgmr.msra.gmra.mrb[0].mxu0 %vm24_vm1, %v1035_v1  ;;  %918 = vmatprep.subr.bf16.mxu1 %v995_v2  ;;  %v323_v21 = vrot.slane %v313_v20, %v1094_v25 }
   0xd   :  { %887 = vmatprep.mubr.msk.f32.mxu0 %vm996_vm0, %v997_v8  ;;  %929 = vmatpush3.bf16.msra.mxu0 %v928_v40  ;;  %v376_v40 = vsub.s32 5, %v1091_v24 }
   0xe   :  { %930 = vmatprep.subr.bf16.mxu0 %v995_v2 }
   0xf   :  { %920 = vmatpush3.bf16.msra.mxu1 %v919_v19  ;;  %v1008_v19 = vmov 6  }
  0x10   :  { %921 = vmatprep.subr.bf16.mxu1 %v995_v2 }
  0x11   :  { %932 = vmatpush3.bf16.msra.mxu0 %v931_v55 }
  0x12   :  { %933 = vmatprep.subr.bf16.mxu0 %v995_v2 }
  0x13   :  { %923 = vmatpush3.bf16.msra.mxu1 %v922_v22  ;;  %v1177_v22 = vsub.s32 2, %v1091_v24 }
  0x14   :  { %924 = vmatprep.subr.bf16.mxu1 %v995_v2 }
  0x17   :  { %926 = vmatpush3.bf16.msra.mxu1 %v925_v31 }
  0x18   :  { %901 = vmatprep.subr.mxu1 %v997_v8 }
  0x81   :  { %v102_v28 = vpop.permute.xlu0 %101 }
  0x82   :  { %v108_v35 = vmul.f32 %v107_v32, %v102_v28  ;;  %v337_v28 = vrot.slane %v313_v20, %v1097_v26  ;;  %v347_v32 = vrot.slane %v313_v20, %v1177_v22 }
  0x86   :  { %v111_v34 = vpop.permute.xlu0 %110 }
  0x87   :  { %v117_v36 = vmul.f32 %v116_v33, %v111_v34  ;;  %v1185_v33 = vsub.s32 3, %v1091_v24 }
  0x89   :  { %v118_v41 = vadd.f32 %v117_v36, %v108_v35  ;;  %v366_v36 = vsub.s32 4, %v1091_v24 }
  0x8b   :  { %v124_v42 = vadd.f32 %v803_v39, %v118_v41  ;;  %v357_v39 = vrot.slane %v313_v20, %v1185_v33 }
  0x8d   :  { %v125_v43 = vmax.f32 %v124_v42, 0.0  ;;  %v367_v42 = vrot.slane %v313_v20, %v366_v36 }
  0x8f   :  { %127 = vrot.lane.b32.xlu1 %v125_v43, %s999_s21 }
  0x93   :  { %130 = vrot.lane.b32.xlu1 %v1035_v1, %s1000_s22 }
  0xdf   :  { %v94_v44 = vpop.f32.mrb[0].mxu0 }
  0xe0   :  { %v855_v45 = vpop.f32.mrb[1].mxu0  ;;  %v95_v47 = vadd.f32 %v801_v46, %v94_v44 }
  0xe2   :  { %v98_v48 = vmax.f32 %v95_v47, 0.0  ;;  %v377_v47 = vrot.slane %v313_v20, %v376_v40  ;;  %v666_v40 = vld [vmem:[%s1269_s2 + $0x8] sm:$0xff] }
 0x101   :  { %v128_v49 = vpop.permute.xlu1 %127 }
 0x102   :  { %v133_v50 = vsel %vm24_vm1, %v98_v48, %v128_v49  ;;  %v386_v48 = vsub.s32 6, %v1091_v24 }
 0x104   :  { %v387_v54 = vrot.slane %v313_v20, %v386_v48  ;;  %v669_v48 = vld [vmem:[%s1269_s2 + $0x20] sm:$0xff] }
 0x105   :  { %v131_v51 = vpop.permute.xlu1 %130 }
 0x106   :  { %v135_v52 = vsel %vm134_vm2, %v133_v50, %v131_v51  ;;  %v396_v50 = vsub.s32 7, %v1091_v24  ;;  %v529_v24 = vrot.slane %v1035_v1, 2 }
 0x107   :  { %877 = vmatmul.mubr.msk.f32.vlgmr.msra.gmra.mrb[0].mxu1 %vm151_vm3, %v135_v52 }
 0x108   :  { %903 = vmatprep.mubr.msk.f32.mxu1 %vm996_vm0, %v997_v8  ;;  %v397_v55 = vrot.slane %v313_v20, %v396_v50 }
 0x1da   :  { %v221_v59 = vpop.f32.mrb[0].mxu1 }
 0x1db   :  { %v222_v60 = vadd.f32 %v804_v56, %v221_v59  ;;  %v878_v61 = vpop.f32.mrb[1].mxu1 }
 0x1dd   :  { %v1145_v63 = vmax.f32 %v222_v60, 0.0 }
 0x1df   :  { %888 = vmatmul.mubr.msk.f32.vlgmr.msra.gmra.mrb[2].mxu0 %vm24_vm1, %v1145_v63 }
 0x1e0   :  { %935 = vmatpush3.bf16.msra.mxu0 %v934_v62  ;;  %898 = vmatprep.mubr.msk.f32.mxu0 %vm996_vm0, %v997_v8 }
 0x1e1   :  { %936 = vmatprep.subr.bf16.mxu0 %v995_v2 }
 0x1e4   :  { %938 = vmatpush3.bf16.msra.mxu0 %v937_v4  ;;  %v400_v4 = vld [vmem:[%s1268_s1 + $0xc8] sm:$0xf] }
 0x1e5   :  { %v484_v1 = vrot.slane %v400_v4, %v1094_v25 }
 0x1e7   :  { %899 = vmatmul.mubr.msk.f32.vlgmr.msra.gmra.mrb[4].mxu0 %vm24_vm1, %v1145_v63 }
 0x1e8   :  { %753 = vmatprep.mubr.f32.mxu0 %v997_v8 }
 0x2b2   :  { %v308_v9 = vpop.f32.mrb[2].mxu0 }
 0x2b3   :  { %v309_v10 = vadd.f32 %v806_v7, %v308_v9  ;;  %v889_v11 = vpop.f32.mrb[3].mxu0  ;;  %v539_v7 = vld [vmem:[%s1268_s1 + $0xb0] sm:$0xff] }
 0x2b4   :  { %902 = vmatpush3.msra.mxu1 %v539_v7 }
 0x2b5   :  { %v312_v2 = vmax.f32 %v309_v10, 0.0  ;;  %v494_v10 = vrot.slane %v400_v4, %v1097_v26 }
 0x2b7   :  { %331 = vperm.xlu0 %968, %v312_v2   ;;  %317 = vperm.xlu1 %967, %v312_v2  }
 0x2ba   :  { %v1166_v12 = vpop.f32.mrb[4].mxu0 }
 0x2bb   :  { %v900_v13 = vpop.f32.mrb[5].mxu0  ;;  %971 = vset.pattern.permute.xlu0 %v1003_v14  ;;  %969 = vset.pattern.permute.xlu1 %v1004_v15 }
 0x2bc   :  { %361 = vperm.xlu0 %971, %v312_v2   ;;  %341 = vperm.xlu1 %969, %v312_v2  }
 0x2c0   :  { %974 = vset.pattern.permute.xlu0 %v1005_v16  ;;  %970 = vset.pattern.permute.xlu1 %v1006_v17 }
 0x2c1   :  { %391 = vperm.xlu0 %974, %v312_v2   ;;  %351 = vperm.xlu1 %970, %v312_v2  }
 0x2c5   :  { %972 = vset.pattern.permute.xlu1 %v1007_v18  ;;  %977 = vset.pattern.permute.xlu0 %v1004_v15  ;;  %v514_v18 = vrot.slane %v400_v4, %v1185_v33 }
 0x2c6   :  { %371 = vperm.xlu1 %972, %v312_v2  }
 0x2ca   :  { %973 = vset.pattern.permute.xlu1 %v1008_v19 }
 0x2cb   :  { %381 = vperm.xlu1 %973, %v312_v2   ;;  %v504_v2 = vrot.slane %v400_v4, %v1177_v22 }
 0x2cf   :  { %975 = vset.pattern.permute.xlu1 %v1001_v5 }
 0x336   :  { %v318_v27 = vpop.permute.xlu1 %317  ;;  %v332_v30 = vpop.permute.xlu0 %331 }
 0x337   :  { %v324_v29 = vmul.f32 %v323_v21, %v318_v27  ;;  %v338_v34 = vmul.f32 %v337_v28, %v332_v30 }
 0x339   :  { %v329_v31 = vadd.f32 %v808_v23, %v324_v29 }
 0x33b   :  { %v342_v35 = vpop.permute.xlu1 %341  ;;  %v339_v37 = vadd.f32 %v338_v34, %v329_v31  ;;  %v362_v45 = vpop.permute.xlu0 %361 }
 0x33c   :  { %v348_v38 = vmul.f32 %v347_v32, %v342_v35  ;;  %v368_v49 = vmul.f32 %v367_v42, %v362_v45  ;;  %v670_v45 = vld [vmem:[%s1269_s2 + $0x28] sm:$0xff] }
 0x33e   :  { %v349_v43 = vadd.f32 %v348_v38, %v339_v37 }
 0x340   :  { %v352_v41 = vpop.permute.xlu1 %351  ;;  %v392_v56 = vpop.permute.xlu0 %391 }
 0x341   :  { %v358_v44 = vmul.f32 %v357_v39, %v352_v41  ;;  %v398_v60 = vmul.f32 %v397_v55, %v392_v56  ;;  %v668_v41 = vld [vmem:[%s1269_s2 + $0x18] sm:$0xff] }
 0x342   :  { %v939_v42 = vpack.c.bf16 %v668_v41, %v666_v40  ;;  %v811_v55 = vld [vmem:[%s1268_s1 + $0xde] ss:$0 sm:$0xff] }
 0x343   :  { %v359_v46 = vadd.f32 %v358_v44, %v349_v43  ;;  %v667_v43 = vld [vmem:[%s1269_s2 + $0x10] sm:$0xff] }
 0x344   :  { %940 = vmatprep.subr.bf16.mxu0 %v939_v42 }
 0x345   :  { %v372_v51 = vpop.permute.xlu1 %371  ;;  %v369_v52 = vadd.f32 %v368_v49, %v359_v46  ;;  %v672_v46 = vld [vmem:[%s1269_s2 + $0x38] sm:$0xff]  ;;  %v671_v49 = vld [vmem:[%s1269_s2 + $0x30] sm:$0xff] }
 0x346   :  { %v378_v53 = vmul.f32 %v377_v47, %v372_v51  ;;  %v943_v47 = vpack.c.bf16 %v672_v46, %v670_v45  ;;  %v945_v50 = vpack.c.bf16 %v671_v49, %v669_v48 }
 0x348   :  { %v379_v58 = vadd.f32 %v378_v53, %v369_v52  ;;  %v619_v52 = vld [vmem:[%s1268_s1 + $0xd0] sm:$0xf] }
 0x349   :  { %v631_v53 = vrot.slane %v619_v52, %v1094_v25  ;;  %v641_v56 = vrot.slane %v619_v52, %v1097_v26 }
 0x34a   :  { %v382_v57 = vpop.permute.xlu1 %381 }
 0x34b   :  { %v388_v59 = vmul.f32 %v387_v54, %v382_v57 }
 0x34d   :  { %v389_v61 = vadd.f32 %v388_v59, %v379_v58 }
 0x34f   :  { %v399_v62 = vadd.f32 %v398_v60, %v389_v61  ;;  %v651_v60 = vrot.slane %v619_v52, %v1177_v22 }
 0x351   :  { %498 = vperm.xlu0 %977, %v399_v62   ;;  %478 = vperm.xlu1 %975, %v399_v62   ;;  %v620_v0 = vrot.slane %v399_v62, 6 }
 0x353   :  { %v622_v3 = vsel %vm523_vm4, %v399_v62, %v620_v0 }
 0x355   :  { %976 = vset.pattern.permute.xlu1 %v1002_v6  ;;  %980 = vset.pattern.permute.xlu0 %v1002_v6 }
 0x356   :  { %488 = vperm.xlu1 %976, %v399_v62  }
 0x35a   :  { %978 = vset.pattern.permute.xlu1 %v1006_v17 }
 0x35b   :  { %508 = vperm.xlu1 %978, %v399_v62  }
 0x35f   :  { %530 = vrot.lane.b32.xlu1 %v529_v24, %s1009_s18  ;;  %v661_v24 = vrot.slane %v619_v52, %v1185_v33 }
 0x360   :  { %979 = vset.pattern.permute.xlu1 %v1001_v5  ;;  %v809_v5 = vld [vmem:[%s1268_s1 + $0xdd] ss:$0 sm:$0xff] }
 0x361   :  { %v473_v11 = vadd.f32 %v809_v5, %v1166_v12 }
 0x363   :  { %625 = vperm.xlu1 %979, %v622_v3  }
 0x367   :  { %981 = vset.pattern.permute.xlu1 %v1004_v15 }
 0x368   :  { %645 = vperm.xlu1 %981, %v622_v3  }
 0x36c   :  { %982 = vset.pattern.permute.xlu1 %v1006_v17 }
 0x36d   :  { %655 = vperm.xlu1 %982, %v622_v3  }
 0x3d0   :  { %v479_v6 = vpop.permute.xlu1 %478  ;;  %v499_v13 = vpop.permute.xlu0 %498 }
 0x3d1   :  { %v485_v9 = vmul.f32 %v484_v1, %v479_v6  ;;  %v505_v19 = vmul.f32 %v504_v2, %v499_v13 }
 0x3d3   :  { %v486_v15 = vadd.f32 %v485_v9, %v473_v11  ;;  %v813_v11 = vld [vmem:[%s1269_s2 + $0x40] ss:$8 sm:$0x3] }
 0x3d4   :  { %v679_v22 = vrot.slane %v813_v11, %v1094_v25  ;;  %v683_v2 = vrot.slane %v813_v11, %v1097_v26 }
 0x3d5   :  { %v489_v14 = vpop.permute.xlu1 %488 }
 0x3d6   :  { %v495_v16 = vmul.f32 %v494_v10, %v489_v14 }
 0x3d8   :  { %v496_v20 = vadd.f32 %v495_v16, %v486_v15 }
 0x3da   :  { %v509_v21 = vpop.permute.xlu1 %508  ;;  %v506_v23 = vadd.f32 %v505_v19, %v496_v20 }
 0x3db   :  { %v515_v27 = vmul.f32 %v514_v18, %v509_v21 }
 0x3dd   :  { %v516_v28 = vadd.f32 %v515_v27, %v506_v23 }
 0x3de   :  { %v531_v32 = vpop.permute.xlu1 %530 }
 0x3df   :  { %v517_v29 = vmul.f32 0.5, %v516_v28  ;;  %775 = vrot.lane.b32.xlu1 %v516_v28, %s1010_s25  ;;  %v521_v36 = vrot.slane %v516_v28, 6 }
 0x3e1   :  { %v518_v30 = vmul.f32 1.442695, %v517_v29  ;;  %v524_v37 = vsel %vm523_vm4, %v516_v28, %v521_v36 }
 0x3e2   :  { %v626_v51 = vpop.permute.xlu1 %625 }
 0x3e3   :  { %984 = vpow2.f32 %v518_v30  ;;  %v632_v59 = vmul.f32 %v631_v53, %v626_v51  ;;  %v786_v30 = vrot.slane %v997_v8, 4 }
 0x3e7   :  { %v646_v54 = vpop.permute.xlu1 %645 }
 0x3e8   :  { %v652_v1 = vmul.f32 %v651_v60, %v646_v54 }
 0x3ec   :  { %v656_v4 = vpop.permute.xlu1 %655 }
 0x3ed   :  { %v985_v12 = vpop.eup %984  ;;  %v662_v5 = vmul.f32 %v661_v24, %v656_v4 }
 0x3ee   :  { %v526_v31 = vrot.slane %v985_v12, 6 }
 0x3f0   :  { %v528_v34 = vsel %vm523_vm4, %v985_v12, %v526_v31 }
 0x3f1   :  { %v533_v35 = vmul.f32 %v531_v32, %v528_v34 }
 0x3f3   :  { %535 = vrot.lane.b32.xlu0 %v533_v35, %s1011_s26 }
 0x3f7   :  { %635 = vperm.xlu0 %980, %v622_v3  }
 0x3fb   :  { %772 = vrot.lane.b32.xlu0 %v399_v62, %s999_s21 }
 0x3fc   :  { %983 = vset.pattern.permute.xlu0 %v1006_v17  ;;  %v665_v17 = vld [vmem:[%s1269_s2] sm:$0xff] }
 0x3fd   :  { %v941_v44 = vpack.c.bf16 %v667_v43, %v665_v17 }
 0x3ff   :  { %942 = vmatpush1.bf16.msra.mxu0 %v941_v44 }
 0x400   :  { %944 = vmatprep.subr.bf16.mxu0 %v943_v47 }
 0x403   :  { %946 = vmatpush1.bf16.msra.mxu0 %v945_v50 }
 0x451   :  { %v776_v25 = vpop.permute.xlu1 %775 }
 0x465   :  { %v536_v38 = vpop.permute.xlu0 %535 }
 0x466   :  { %v538_v39 = vadd.f32 %v536_v38, %v524_v37 }
 0x468   :  { %904 = vmatmul.mubr.msk.f32.vlgmr.msra.gmra.mrb[2].mxu1 %vm545_vm5, %v538_v39 }
 0x476   :  { %v636_v57 = vpop.permute.xlu0 %635 }
 0x477   :  { %v642_v0 = vmul.f32 %v641_v56, %v636_v57 }
 0x47a   :  { %v773_v20 = vpop.permute.xlu0 %772 }
 0x47b   :  { %v778_v28 = vsel %vm24_vm1, %v1145_v63, %v773_v20 }
 0x47c   :  { %v780_v26 = vsel %vm779_vm6, %v778_v28, %v776_v25 }
 0x47d   :  { %v782_v29 = vsel %vm781_vm7, %v780_v26, 0.0 }
 0x47e   :  { %v785_v12 = vrot.slane %v782_v29, 4 }
 0x53b   :  { %v615_v58 = vpop.f32.mrb[2].mxu1 }
 0x53c   :  { %v616_v61 = vadd.f32 %v811_v55, %v615_v58  ;;  %v905_v62 = vpop.f32.mrb[3].mxu1 }
 0x53e   :  { %v633_v3 = vadd.f32 %v632_v59, %v616_v61 }
 0x540   :  { %v643_v6 = vadd.f32 %v642_v0, %v633_v3 }
 0x542   :  { %v653_v7 = vadd.f32 %v652_v1, %v643_v6 }
 0x544   :  { %v663_v9 = vadd.f32 %v662_v5, %v653_v7 }
 0x546   :  { %v664_v10 = vmax.f32 %v663_v9, 0.0 }
 0x548   :  { %814 = vmatmul.mubr.msk.f32.vlgmr.msra.gmra.mrb[6].mxu0 %vm24_vm1, %v664_v10 }
 0x61b   :  { %v755_v33 = vpop.f32.mrb[6].mxu0 }
 0x61c   :  { %v756_v13 = vadd.f32 %v755_v33, %v679_v22  ;;  %v757_v14 = vpop.f32.mrb[7].mxu0 }
 0x61d   :  { %v758_v15 = vadd.f32 %v757_v14, %v683_v2 }
 0x61e   :  { %v815_v16 = vmul.f32 -1.442695, %v756_v13 }
 0x61f   :  { %v816_v18 = vmul.f32 -1.442695, %v758_v15 }
 0x620   :  { %986 = vpow2.f32 %v815_v16 }
 0x621   :  { %988 = vpow2.f32 %v816_v18 }
 0x62a   :  { %v987_v19 = vpop.eup %986 }
 0x62b   :  { %v989_v21 = vpop.eup %988  ;;  %v766_v23 = vadd.f32 1.0, %v987_v19 }
 0x62c   :  { %v767_v27 = vadd.f32 1.0, %v989_v21 }
 0x62d   :  { %990 = vrcp.f32 %v766_v23 }
 0x62e   :  { %992 = vrcp.f32 %v767_v27 }
 0x637   :  { %v991_v31 = vpop.eup %990 }
 0x638   :  { %v993_v32 = vpop.eup %992  ;;  %v790_v34 = vsel %vm789_vm8, %v991_v31, %v785_v12 }
 0x639   :  { %v793_v35 = vsel %vm792_vm9, %v790_v34, 0.0  ;;  %v791_v36 = vsel %vm789_vm8, %v993_v32, %v786_v30 }
 0x63a   :  { %795 = vst [vmem:[%s1270_s3] sm:$0xff] %v793_v35  ;;  %v794_v63 = vsel %vm792_vm9, %v791_v36, 0.0 }
 0x63b   :  { %796 = vst [vmem:[%s1270_s3 + $0x8] sm:$0xff] %v794_v63 }

</bundles_post_ra>
